<compile_context>
chip_gen: v7x
topology: tpu7x:2x2x1
jax: 0.10.0
libtpu: 0.0.40
codegen_flags: <defaults>
</compile_context>

<pallas_src>
import jax
import jax.numpy as jnp
from jax.experimental import pallas as pl
from jax.experimental.pallas import tpu as pltpu  # noqa: F401  (TPU backend)


def _pos_embed_kernel(col_t_ref, row_t_ref, out_ref):
    # col_t_ref: (F, W)    -- col_embed.weight[:W].T
    # row_t_ref: (F, H)    -- row_embed.weight[:H].T
    # out_ref:   (2F, H*W) -- flattened, lane-dense output slab
    col_t = col_t_ref[...]                 # (F, W)
    row_t = row_t_ref[...]                 # (F, H)
    F, W = col_t.shape
    H = row_t.shape[1]

    # x half: out[f, h*W + w] = col_t[f, w]   (period-W tiling along lanes)
    out_ref[:F, :] = jnp.tile(col_t, (1, H)).astype(out_ref.dtype)
    # y half: out[F + f, h*W + w] = row_t[f, h]  (each column repeated W times)
    out_ref[F:, :] = jnp.repeat(row_t, W, axis=1).astype(out_ref.dtype)


def position_embedding_learned(x, row_weight, col_weight):
    """x: (B, C, H, W); row_weight/col_weight: (num_xy, F). Returns (B, 2F, H, W)."""
    B = x.shape[0]
    H, W = x.shape[-2], x.shape[-1]
    F = row_weight.shape[1]

    if H > row_weight.shape[0] or W > col_weight.shape[0]:
        raise ValueError(
            "H/W exceed embedding table size "
            f"(H={H}, W={W}, num_xy={row_weight.shape[0]})"
        )

    out_dtype = jnp.result_type(row_weight.dtype, col_weight.dtype)

    # Embedding lookup with arange indices == leading slice; transpose once in
    # the wrapper so F lands on sublanes and the spatial axis on lanes (glue).
    col_t = col_weight[:W].T.astype(out_dtype)   # (F, W)
    row_t = row_weight[:H].T.astype(out_dtype)   # (F, H)

    pos2d = pl.pallas_call(
        _pos_embed_kernel,
        out_shape=jax.ShapeDtypeStruct((2 * F, H * W), out_dtype),
        grid=(1,),
        in_specs=[
            pl.BlockSpec((F, W), lambda i: (0, 0)),
            pl.BlockSpec((F, H), lambda i: (0, 0)),
        ],
        out_specs=pl.BlockSpec((2 * F, H * W), lambda i: (0, 0)),
    )(col_t, row_t)

    # Layout plumbing back to NCHW + batch broadcast (glue, plain JAX).
    pos = pos2d.reshape(2 * F, H, W)
    return jnp.broadcast_to(pos[None], (B, 2 * F, H, W))


def _reference(x, row_weight, col_weight):
    B = x.shape[0]
    H, W = x.shape[-2], x.shape[-1]
    x_emb = col_weight[:W]                                   # (W, F)
    y_emb = row_weight[:H]                                   # (H, F)
    pos = jnp.concatenate(
        [
            jnp.broadcast_to(x_emb[None, :, :], (H, W, x_emb.shape[1])),
            jnp.broadcast_to(y_emb[:, None, :], (H, W, y_emb.shape[1])),
        ],
        axis=-1,
    )                                                        # (H, W, 2F)
    pos = jnp.transpose(pos, (2, 0, 1))[None]                # (1, 2F, H, W)
    return jnp.broadcast_to(pos, (B,) + pos.shape[1:])


if __name__ == "__main__":
    # Module config
    num_pos_feats = 32
    num_xy = 16

    # Input (only shape / device matter for the forward pass)
    B, C, H, W = 2, 4, 16, 16

    key = jax.random.PRNGKey(0)
    k_x, k_row, k_col = jax.random.split(key, 3)
    x = jax.random.normal(k_x, (B, C, H, W), dtype=jnp.float32)

    # nn.init.uniform_ -> U[0, 1)
    row_weight = jax.random.uniform(k_row, (num_xy, num_pos_feats), dtype=jnp.float32)
    col_weight = jax.random.uniform(k_col, (num_xy, num_pos_feats), dtype=jnp.float32)

    pos = position_embedding_learned(x, row_weight, col_weight)
    pos = jax.block_until_ready(pos)

    ref = _reference(x, row_weight, col_weight)
    assert pos.shape == (B, 2 * num_pos_feats, H, W), pos.shape
    assert jnp.allclose(pos, ref), "mismatch vs reference"

    print("KERNEL_OK")
</pallas_src>

<mosaic_0001>
module attributes {stable_mosaic.version = 11 : i64} {
  func.func @_pos_embed_kernel(%arg0: i32, %arg1: memref<32x16xf32, #tpu.memory_space<vmem>>, %arg2: memref<32x16xf32, #tpu.memory_space<vmem>>, %arg3: memref<64x256xf32, #tpu.memory_space<vmem>>) attributes {dimension_semantics = [#tpu.dimension_semantics<arbitrary>], iteration_bounds = array<i64: 1>, scalar_prefetch = 0 : i64, scratch_operands = 0 : i64, tpu.core_type = #tpu.core_type<tc>, window_params = [{pipeline_mode = #tpu.pipeline_mode<synchronous>, transform_indices = @transform_0, window_bounds = array<i64: 32, 16>}, {pipeline_mode = #tpu.pipeline_mode<synchronous>, transform_indices = @transform_1, window_bounds = array<i64: 32, 16>}, {pipeline_mode = #tpu.pipeline_mode<synchronous>, transform_indices = @transform_2, window_bounds = array<i64: 64, 256>}]} {
    %c0 = arith.constant 0 : index
    %c0_0 = arith.constant 0 : index
    %0 = vector.load %arg1[%c0, %c0_0] : memref<32x16xf32, #tpu.memory_space<vmem>>, vector<32x16xf32>
    %c0_1 = arith.constant 0 : index
    %c0_2 = arith.constant 0 : index
    %1 = vector.load %arg2[%c0_1, %c0_2] : memref<32x16xf32, #tpu.memory_space<vmem>>, vector<32x16xf32>
    %2 = tpu.concatenate %0, %0, %0, %0, %0, %0, %0, %0, %0, %0, %0, %0, %0, %0, %0, %0 in 1 : vector<32x16xf32>, vector<32x16xf32>, vector<32x16xf32>, vector<32x16xf32>, vector<32x16xf32>, vector<32x16xf32>, vector<32x16xf32>, vector<32x16xf32>, vector<32x16xf32>, vector<32x16xf32>, vector<32x16xf32>, vector<32x16xf32>, vector<32x16xf32>, vector<32x16xf32>, vector<32x16xf32>, vector<32x16xf32> -> vector<32x256xf32>
    %c0_3 = arith.constant 0 : index
    %c0_4 = arith.constant 0 : index
    %3 = vector.load %arg3[%c0_3, %c0_4] : memref<64x256xf32, #tpu.memory_space<vmem>>, vector<32x256xf32>
    tpu.vector_store %arg3[%c0_3, %c0_4], %2 {strides = array<i32>} : memref<64x256xf32, #tpu.memory_space<vmem>>, vector<32x256xf32>,
    %4 = vector.shape_cast %1 : vector<32x16xf32> to vector<32x16x1xf32>
    %5 = vector.broadcast %4 : vector<32x16x1xf32> to vector<32x16x16xf32>
    %6 = vector.shape_cast %5 : vector<32x16x16xf32> to vector<32x256xf32>
    %c32 = arith.constant 32 : index
    %c0_5 = arith.constant 0 : index
    %7 = vector.load %arg3[%c32, %c0_5] : memref<64x256xf32, #tpu.memory_space<vmem>>, vector<32x256xf32>
    tpu.vector_store %arg3[%c32, %c0_5], %6 {strides = array<i32>} : memref<64x256xf32, #tpu.memory_space<vmem>>, vector<32x256xf32>,
    return
  }
  func.func @transform_0(%arg0: i32) -> (i32, i32) {
    %c0_i32 = arith.constant 0 : i32
    %c0_i32_0 = arith.constant 0 : i32
    %c0_i32_1 = arith.constant 0 : i32
    return %c0_i32, %c0_i32_0 : i32, i32
  }
  func.func @transform_1(%arg0: i32) -> (i32, i32) {
    %c0_i32 = arith.constant 0 : i32
    %c0_i32_0 = arith.constant 0 : i32
    %c0_i32_1 = arith.constant 0 : i32
    return %c0_i32, %c0_i32_0 : i32, i32
  }
  func.func @transform_2(%arg0: i32) -> (i32, i32) {
    %c0_i32 = arith.constant 0 : i32
    %c0_i32_0 = arith.constant 0 : i32
    %c0_i32_1 = arith.constant 0 : i32
    return %c0_i32, %c0_i32_0 : i32, i32
  }
}

</mosaic_0001>

<bundles_post_ra>
// kernel: tpu_custom_call.1
= control target key start
LH: loop header
LB: loop body
LE: loop exit
PB: predicated region body
PF: predicated region fallthrough
CT: control target
= control target key end

     0   :  { %s1930_s13 = smov 16   ;;  %s2894_s0 = inlined_call_operand.vmem [shape: f32[32,16], index: 0, kind: input, shape index: {}]   ;;  %s2895_s1 = inlined_call_operand.vmem [shape: f32[32,16], index: 1, kind: input, shape index: {}]   ;;  %s2896_s2 = inlined_call_operand.hbm [shape: f32[64,256], index: 2, kind: output, shape index: {}]  }
   0x1   :  { %v1959_v0 = vld [vmem:[%s2894_s0 + $0x10] sm:$0xff]  ;;  %v1964_v1 = vld [vmem:[%s2894_s0] sm:$0xff]  ;;  %v1973_v2 = vld [vmem:[%s2894_s0 + $0x18] sm:$0xff] }
   0x2   :  { %28 = vrot.lane.b32.xlu1 %v1959_v0, %s1930_s13  ;;  %24 = vrot.lane.b32.xlu0 %v1964_v1, %s1930_s13  ;;  %v1978_v3 = vld [vmem:[%s2894_s0 + $0x8] sm:$0xff] }
   0x3   :  { %7 = vsyncpa [#allocation3], 0  ;;  %s1931_s18 = smov 32   ;;  %s1932_s0 = smov 48   ;;  %v151_v4 = vlaneseq  ;;  %v16_v7 = vld [vmem:[%s2895_s1] sm:$0xff]  ;;  %v17_v23 = vld [vmem:[%s2895_s1 + $0x8] sm:$0xff] }
   0x4   :  { %s1933_s19 = smov 64   ;;  %s1934_s20 = smov 80   ;;  %v18_v32 = vld [vmem:[%s2895_s1 + $0x10] sm:$0xff]  ;;  %v2100_v57 = vld [vmem:[%s2895_s1 + $0x18] sm:$0xff]  ;;  %vm108_vm0 = vcmask 130048   ;;  %vm113_vm1 = vcmask 261120  }
   0x5   :  { %s1935_s21 = smov 96   ;;  %v2024_v5 = vshrl.u32 %v151_v4, 7  ;;  %s1936_s22 = smov 112   ;;  %vm118_vm2 = vcmask 392192   ;;  %vm123_vm3 = vcmask 523264   ;;  %vm128_vm4 = vcmask 654336  }
   0x6   :  { %30 = vrot.lane.b32.xlu1 %v1973_v2, %s1930_s13  ;;  %26 = vrot.lane.b32.xlu0 %v1978_v3, %s1930_s13  ;;  %vm133_vm5 = vcmask 785408   ;;  %vm138_vm6 = vcmask 916480   ;;  %s1939_s1 = smov [#allocation2]  }
   0x7   :  { %v2031_v6 = vsub.s32 0, %v2024_v5  ;;  %v2042_v9 = vsub.s32 1, %v2024_v5  ;;  %v2046_v11 = vsub.s32 2, %v2024_v5  ;;  %v2050_v13 = vsub.s32 3, %v2024_v5  ;;  %s1884_s3 = sshll.u32 %s1939_s1, 4  ;;  %s1885_s3 = int_to_ptr.vmem [resolvable:$true] %s1884_s3 }
   0x8   :  { %v2054_v15 = vsub.s32 4, %v2024_v5  ;;  %v2058_v17 = vsub.s32 5, %v2024_v5  ;;  %v2062_v19 = vsub.s32 6, %v2024_v5  ;;  %v2066_v21 = vsub.s32 7, %v2024_v5  ;;  %s1906_s4 = scalar_lea.vmem %s1885_s3, 2048  ;;  %p1911_p1 = scmp.lt.s32.totalorder %s1885_s3, %s1885_s3 }
   0x9   :  { %v154_v8 = vrot.slane %v16_v7, %v2031_v6  ;;  %v165_v10 = vrot.slane %v16_v7, %v2042_v9  ;;  %v176_v12 = vrot.slane %v16_v7, %v2046_v11  ;;  %v187_v14 = vrot.slane %v16_v7, %v2050_v13  ;;  %p1907_p0 = scmp.ne.s32.totalorder %s1885_s3, %s1906_s4  ;;  %p1912_p2 = scmp.lt.s32.totalorder %s1906_s4, %s1906_s4 }
   0xa   :  { %38 = vrot.lane.b32.xlu1 %v1978_v3, %s1931_s18  ;;  %36 = vrot.lane.b32.xlu0 %v1964_v1, %s1931_s18  ;;  %v198_v16 = vrot.slane %v16_v7, %v2054_v15  ;;  %v209_v18 = vrot.slane %v16_v7, %v2058_v17  ;;  %v220_v20 = vrot.slane %v16_v7, %v2062_v19 }
   0xb   :  { %v231_v22 = vrot.slane %v16_v7, %v2066_v21  ;;  %v242_v24 = vrot.slane %v17_v23, %v2031_v6  ;;  %v253_v25 = vrot.slane %v17_v23, %v2042_v9  ;;  %v264_v26 = vrot.slane %v17_v23, %v2046_v11  ;;  %p1913_p3 = por %p1912_p2, %p1911_p1 }
   0xc   :  { %v275_v27 = vrot.slane %v17_v23, %v2050_v13  ;;  %v286_v28 = vrot.slane %v17_v23, %v2054_v15  ;;  %v297_v29 = vrot.slane %v17_v23, %v2058_v17  ;;  %v308_v30 = vrot.slane %v17_v23, %v2062_v19 }
   0xd   :  { %v319_v31 = vrot.slane %v17_v23, %v2066_v21  ;;  %v330_v35 = vrot.slane %v18_v32, %v2031_v6  ;;  %v341_v38 = vrot.slane %v18_v32, %v2042_v9  ;;  %v352_v41 = vrot.slane %v18_v32, %v2046_v11  ;;  %p1914_p4 = pnand %p1913_p3, %p1907_p0 }
   0xe   :  { %42 = vrot.lane.b32.xlu1 %v1973_v2, %s1931_s18  ;;  %40 = vrot.lane.b32.xlu0 %v1959_v0, %s1931_s18  ;;  %v363_v44 = vrot.slane %v18_v32, %v2050_v13  ;;  %v374_v47 = vrot.slane %v18_v32, %v2054_v15  ;;  %v385_v50 = vrot.slane %v18_v32, %v2058_v17 }
   0xf   :  { %v396_v53 = vrot.slane %v18_v32, %v2062_v19  ;;  %v407_v56 = vrot.slane %v18_v32, %v2066_v21  ;;  %v418_v60 = vrot.slane %v2100_v57, %v2031_v6  ;;  %v429_v7 = vrot.slane %v2100_v57, %v2042_v9 }
  0x10   :  { %v440_v6 = vrot.slane %v2100_v57, %v2046_v11 }
  0x12   :  { %50 = vrot.lane.b32.xlu1 %v1978_v3, %s1932_s0  ;;  %48 = vrot.lane.b32.xlu0 %v1964_v1, %s1932_s0 }
  0x16   :  { %54 = vrot.lane.b32.xlu1 %v1973_v2, %s1932_s0  ;;  %52 = vrot.lane.b32.xlu0 %v1959_v0, %s1932_s0 }
  0x1a   :  { %62 = vrot.lane.b32.xlu1 %v1978_v3, %s1933_s19  ;;  %60 = vrot.lane.b32.xlu0 %v1964_v1, %s1933_s19 }
  0x1e   :  { %66 = vrot.lane.b32.xlu1 %v1973_v2, %s1933_s19  ;;  %64 = vrot.lane.b32.xlu0 %v1959_v0, %s1933_s19 }
  0x22   :  { %74 = vrot.lane.b32.xlu1 %v1978_v3, %s1934_s20  ;;  %72 = vrot.lane.b32.xlu0 %v1964_v1, %s1934_s20 }
  0x26   :  { %78 = vrot.lane.b32.xlu1 %v1973_v2, %s1934_s20  ;;  %76 = vrot.lane.b32.xlu0 %v1959_v0, %s1934_s20 }
  0x2a   :  { %86 = vrot.lane.b32.xlu1 %v1978_v3, %s1935_s21  ;;  %84 = vrot.lane.b32.xlu0 %v1964_v1, %s1935_s21 }
  0x2e   :  { %90 = vrot.lane.b32.xlu1 %v1973_v2, %s1935_s21  ;;  %88 = vrot.lane.b32.xlu0 %v1959_v0, %s1935_s21 }
  0x32   :  { %98 = vrot.lane.b32.xlu1 %v1978_v3, %s1936_s22  ;;  %96 = vrot.lane.b32.xlu0 %v1964_v1, %s1936_s22 }
  0x36   :  { %100 = vrot.lane.b32.xlu0 %v1959_v0, %s1936_s22  ;;  %102 = vrot.lane.b32.xlu1 %v1973_v2, %s1936_s22 }
  0x3a   :  { %156 = vbcast.lane.b32.xlu0 %v154_v8, 256  ;;  %160 = vbcast.lane.b32.xlu1 %v154_v8, 264 }
  0x3e   :  { %167 = vbcast.lane.b32.xlu0 %v165_v10, 256  ;;  %171 = vbcast.lane.b32.xlu1 %v165_v10, 264 }
  0x42   :  { %178 = vbcast.lane.b32.xlu0 %v176_v12, 256  ;;  %182 = vbcast.lane.b32.xlu1 %v176_v12, 264 }
  0x46   :  { %189 = vbcast.lane.b32.xlu0 %v187_v14, 256  ;;  %193 = vbcast.lane.b32.xlu1 %v187_v14, 264 }
  0x4a   :  { %200 = vbcast.lane.b32.xlu0 %v198_v16, 256  ;;  %204 = vbcast.lane.b32.xlu1 %v198_v16, 264 }
  0x4e   :  { %211 = vbcast.lane.b32.xlu0 %v209_v18, 256  ;;  %215 = vbcast.lane.b32.xlu1 %v209_v18, 264 }
  0x52   :  { %222 = vbcast.lane.b32.xlu0 %v220_v20, 256  ;;  %226 = vbcast.lane.b32.xlu1 %v220_v20, 264 }
  0x56   :  { %233 = vbcast.lane.b32.xlu0 %v231_v22, 256  ;;  %237 = vbcast.lane.b32.xlu1 %v231_v22, 264 }
  0x5a   :  { %244 = vbcast.lane.b32.xlu0 %v242_v24, 256  ;;  %248 = vbcast.lane.b32.xlu1 %v242_v24, 264 }
  0x5e   :  { %255 = vbcast.lane.b32.xlu0 %v253_v25, 256  ;;  %259 = vbcast.lane.b32.xlu1 %v253_v25, 264  ;;  %v451_v25 = vrot.slane %v2100_v57, %v2050_v13 }
  0x62   :  { %266 = vbcast.lane.b32.xlu0 %v264_v26, 256  ;;  %270 = vbcast.lane.b32.xlu1 %v264_v26, 264 }
  0x66   :  { %277 = vbcast.lane.b32.xlu0 %v275_v27, 256  ;;  %281 = vbcast.lane.b32.xlu1 %v275_v27, 264 }
  0x6a   :  { %288 = vbcast.lane.b32.xlu0 %v286_v28, 256  ;;  %292 = vbcast.lane.b32.xlu1 %v286_v28, 264 }
  0x6e   :  { %299 = vbcast.lane.b32.xlu0 %v297_v29, 256  ;;  %303 = vbcast.lane.b32.xlu1 %v297_v29, 264 }
  0x72   :  { %310 = vbcast.lane.b32.xlu0 %v308_v30, 256  ;;  %314 = vbcast.lane.b32.xlu1 %v308_v30, 264 }
  0x74   :  { %v2083_v33 = vpop.permute.xlu1 %28  ;;  %v25_v34 = vpop.permute.xlu0 %24 }
  0x75   :  { %v111_v11 = vsel %vm108_vm0, %v1959_v0, %v2083_v33 }
  0x76   :  { %321 = vbcast.lane.b32.xlu0 %v319_v31, 256  ;;  %325 = vbcast.lane.b32.xlu1 %v319_v31, 264 }
  0x78   :  { %v31_v36 = vpop.permute.xlu1 %30  ;;  %v27_v37 = vpop.permute.xlu0 %26 }
  0x79   :  { %v112_v61 = vsel %vm108_vm0, %v1973_v2, %v31_v36  ;;  %v109_v2 = vsel %vm108_vm0, %v1964_v1, %v25_v34  ;;  %v110_v14 = vsel %vm108_vm0, %v1978_v3, %v27_v37  ;;  %v462_v37 = vrot.slane %v2100_v57, %v2054_v15 }
  0x7a   :  { %332 = vbcast.lane.b32.xlu0 %v330_v35, 256  ;;  %336 = vbcast.lane.b32.xlu1 %v330_v35, 264 }
  0x7c   :  { %v39_v39 = vpop.permute.xlu1 %38  ;;  %v37_v40 = vpop.permute.xlu0 %36 }
  0x7d   :  { %v115_v9 = vsel %vm113_vm1, %v110_v14, %v39_v39  ;;  %v114_v16 = vsel %vm113_vm1, %v109_v2, %v37_v40 }
  0x7e   :  { %343 = vbcast.lane.b32.xlu0 %v341_v38, 256  ;;  %347 = vbcast.lane.b32.xlu1 %v341_v38, 264 }
  0x80   :  { %v43_v42 = vpop.permute.xlu1 %42  ;;  %v2088_v43 = vpop.permute.xlu0 %40 }
  0x81   :  { %v117_v4 = vsel %vm113_vm1, %v112_v61, %v43_v42  ;;  %v116_v28 = vsel %vm113_vm1, %v111_v11, %v2088_v43 }
  0x82   :  { %354 = vbcast.lane.b32.xlu0 %v352_v41, 256  ;;  %358 = vbcast.lane.b32.xlu1 %v352_v41, 264 }
  0x84   :  { %v51_v45 = vpop.permute.xlu1 %50  ;;  %v49_v46 = vpop.permute.xlu0 %48 }
  0x85   :  { %v120_v23 = vsel %vm118_vm2, %v115_v9, %v51_v45  ;;  %v119_v1 = vsel %vm118_vm2, %v114_v16, %v49_v46  ;;  %v484_v46 = vrot.slane %v2100_v57, %v2062_v19 }
  0x86   :  { %365 = vbcast.lane.b32.xlu0 %v363_v44, 256  ;;  %369 = vbcast.lane.b32.xlu1 %v363_v44, 264  ;;  %v473_v44 = vrot.slane %v2100_v57, %v2058_v17  ;;  %v495_v17 = vrot.slane %v2100_v57, %v2066_v21 }
  0x88   :  { %v55_v48 = vpop.permute.xlu1 %54  ;;  %v2092_v49 = vpop.permute.xlu0 %52 }
  0x89   :  { %v122_v12 = vsel %vm118_vm2, %v117_v4, %v55_v48  ;;  %v121_v33 = vsel %vm118_vm2, %v116_v28, %v2092_v49  ;;  %v1938_v4 = vmov 1934713408  }
  0x8a   :  { %376 = vbcast.lane.b32.xlu0 %v374_v47, 256  ;;  %380 = vbcast.lane.b32.xlu1 %v374_v47, 264  ;;  %v1937_v47 = vmov 1983009808  }
  0x8b   :  { %v506_v48 = vunpack.c.l.s4 %v1937_v47 }
  0x8c   :  { %v63_v51 = vpop.permute.xlu1 %62  ;;  %v61_v52 = vpop.permute.xlu0 %60 }
  0x8d   :  { %v125_v3 = vsel %vm123_vm3, %v120_v23, %v63_v51  ;;  %v124_v24 = vsel %vm123_vm3, %v119_v1, %v61_v52  ;;  %v507_v51 = vunpack.c.0.s8 %v506_v48 }
  0x8e   :  { %387 = vbcast.lane.b32.xlu0 %v385_v50, 256  ;;  %391 = vbcast.lane.b32.xlu1 %v385_v50, 264 }
  0x8f   :  { %v2166_v19 = vsub.s32 %v507_v51, %v2024_v5 }
  0x90   :  { %v67_v54 = vpop.permute.xlu1 %66  ;;  %v65_v55 = vpop.permute.xlu0 %64 }
  0x91   :  { %v127_v18 = vsel %vm123_vm3, %v122_v12, %v67_v54  ;;  %v126_v35 = vsel %vm123_vm3, %v121_v33, %v65_v55 }
  0x92   :  { %398 = vbcast.lane.b32.xlu0 %v396_v53, 256  ;;  %402 = vbcast.lane.b32.xlu1 %v396_v53, 264 }
  0x94   :  { %v75_v58 = vpop.permute.xlu1 %74  ;;  %v73_v59 = vpop.permute.xlu0 %72 }
  0x95   :  { %v130_v26 = vsel %vm128_vm4, %v125_v3, %v75_v58  ;;  %v129_v27 = vsel %vm128_vm4, %v124_v24, %v73_v59 }
  0x96   :  { %409 = vbcast.lane.b32.xlu0 %v407_v56, 256  ;;  %413 = vbcast.lane.b32.xlu1 %v407_v56, 264 }
  0x98   :  { %v79_v62 = vpop.permute.xlu1 %78  ;;  %v77_v63 = vpop.permute.xlu0 %76 }
  0x99   :  { %v132_v0 = vsel %vm128_vm4, %v127_v18, %v79_v62  ;;  %v131_v38 = vsel %vm128_vm4, %v126_v35, %v77_v63 }
  0x9a   :  { %420 = vbcast.lane.b32.xlu0 %v418_v60, 256  ;;  %424 = vbcast.lane.b32.xlu1 %v418_v60, 264 }
  0x9c   :  { %v87_v8 = vpop.permute.xlu1 %86  ;;  %v85_v10 = vpop.permute.xlu0 %84 }
  0x9d   :  { %v135_v29 = vsel %vm133_vm5, %v130_v26, %v87_v8  ;;  %v134_v30 = vsel %vm133_vm5, %v129_v27, %v85_v10 }
  0x9e   :  { %431 = vbcast.lane.b32.xlu0 %v429_v7, 256  ;;  %435 = vbcast.lane.b32.xlu1 %v429_v7, 264  ;;  %v570_v7 = vunpack.c.l.s4 %v1938_v4 }
  0xa0   :  { %v91_v20 = vpop.permute.xlu1 %90  ;;  %v89_v22 = vpop.permute.xlu0 %88  ;;  %v571_v2 = vunpack.c.0.s8 %v570_v7 }
  0xa1   :  { %v137_v36 = vsel %vm133_vm5, %v132_v0, %v91_v20  ;;  %v136_v39 = vsel %vm133_vm5, %v131_v38, %v89_v22 }
  0xa2   :  { %442 = vbcast.lane.b32.xlu0 %v440_v6, 256  ;;  %446 = vbcast.lane.b32.xlu1 %v440_v6, 264  ;;  %v2213_v1 = vsub.s32 %v571_v2, %v2024_v5 }
  0xa4   :  { %v99_v31 = vpop.permute.xlu1 %98  ;;  %v97_v32 = vpop.permute.xlu0 %96 }
  0xa5   :  { %v140_v13 = vsel %vm138_vm6, %v135_v29, %v99_v31  ;;  %v139_v34 = vsel %vm138_vm6, %v134_v30, %v97_v32 }
  0xa6   :  { %145 = vst [vmem:[#allocation2 + $0x10] sm:$0xff] %v140_v13  ;;  %146 = vst [vmem:[#allocation2 + $0x18] sm:$0xff] %v140_v13  ;;  %453 = vbcast.lane.b32.xlu0 %v451_v25, 256  ;;  %457 = vbcast.lane.b32.xlu1 %v451_v25, 264 }
  0xa7   :  { %143 = vst [vmem:[#allocation2] sm:$0xff] %v139_v34  ;;  %144 = vst [vmem:[#allocation2 + $0x8] sm:$0xff] %v139_v34 }
  0xa8   :  { %v101_v40 = vpop.permute.xlu0 %100  ;;  %v103_v41 = vpop.permute.xlu1 %102 }
  0xa9   :  { %v141_v42 = vsel %vm138_vm6, %v136_v39, %v101_v40  ;;  %v142_v43 = vsel %vm138_vm6, %v137_v36, %v103_v41 }
  0xaa   :  { %147 = vst [vmem:[#allocation2 + $0x20] sm:$0xff] %v141_v42  ;;  %148 = vst [vmem:[#allocation2 + $0x28] sm:$0xff] %v141_v42  ;;  %464 = vbcast.lane.b32.xlu0 %v462_v37, 256  ;;  %468 = vbcast.lane.b32.xlu1 %v462_v37, 264 }
  0xab   :  { %149 = vst [vmem:[#allocation2 + $0x30] sm:$0xff] %v142_v43  ;;  %150 = vst [vmem:[#allocation2 + $0x38] sm:$0xff] %v142_v43 }
  0xac   :  { %v2149_v15 = vpop.permute.xlu0 %156  ;;  %v2151_v45 = vpop.permute.xlu1 %160 }
  0xae   :  { %475 = vbcast.lane.b32.xlu0 %v473_v44, 256  ;;  %479 = vbcast.lane.b32.xlu1 %v473_v44, 264 }
  0xb0   :  { %v2155_v49 = vpop.permute.xlu0 %167  ;;  %v2157_v50 = vpop.permute.xlu1 %171 }
  0xb1   :  { %2942 = vst [vmem:[#allocation5_spill] sm:$0xff] %v2157_v50 }
  0xb2   :  { %486 = vbcast.lane.b32.xlu0 %v484_v46, 256  ;;  %490 = vbcast.lane.b32.xlu1 %v484_v46, 264 }
  0xb4   :  { %v2161_v52 = vpop.permute.xlu0 %178  ;;  %v2163_v53 = vpop.permute.xlu1 %182 }
  0xb5   :  { %v503_v54 = vcombine.low %v2149_v15, %v2161_v52  ;;  %v1047_v8 = vcombine.low %v2151_v45, %v2163_v53 }
  0xb6   :  { %497 = vbcast.lane.b32.xlu0 %v495_v17, 256  ;;  %501 = vbcast.lane.b32.xlu1 %v495_v17, 264 }
  0xb7   :  { %v511_v57 = vrot.slane %v503_v54, %v2166_v19  ;;  %v2199_v16 = vrot.slane %v1047_v8, %v2166_v19 }
  0xb8   :  { %v2170_v55 = vpop.permute.xlu0 %189  ;;  %v2172_v56 = vpop.permute.xlu1 %193 }
  0xb9   :  { %v519_v21 = vcombine.low %v2155_v49, %v2170_v55  ;;  %v1063_v12 = vcombine.low %v2157_v50, %v2172_v56  ;;  %2946 = vst [vmem:[#allocation9_spill] sm:$0xff] %v2199_v16 }
  0xbb   :  { %v527_v58 = vrot.slane %v519_v21, %v2166_v19  ;;  %v2202_v18 = vrot.slane %v1063_v12, %v2166_v19 }
  0xbc   :  { %v2178_v59 = vpop.permute.xlu0 %200  ;;  %v2180_v60 = vpop.permute.xlu1 %204 }
  0xbd   :  { %2943 = vst [vmem:[#allocation6_spill] sm:$0xff] %v2180_v60  ;;  %v568_v61 = vcombine.high %v511_v57, %v527_v58  ;;  %2947 = vst [vmem:[#allocation10_spill] sm:$0xff] %v2202_v18  ;;  %v567_v24 = vcombine.low %v511_v57, %v527_v58  ;;  %v1111_v0 = vcombine.low %v2199_v16, %v2202_v18 }
  0xbf   :  { %v2228_v32 = vrot.slane %v567_v24, %v2213_v1  ;;  %v2234_v13 = vrot.slane %v568_v61, %v2213_v1  ;;  %v2240_v37 = vrot.slane %v1111_v0, %v2213_v1 }
  0xc0   :  { %v2182_v62 = vpop.permute.xlu0 %211  ;;  %v2184_v63 = vpop.permute.xlu1 %215 }
  0xc1   :  { %2944 = vst [vmem:[#allocation7_spill] sm:$0xff] %v2184_v63  ;;  %2951 = vst [vmem:[#allocation14_spill] sm:$0xff] %v2240_v37 }
  0xc4   :  { %v2188_v10 = vpop.permute.xlu0 %222  ;;  %v2192_v6 = vpop.permute.xlu1 %226 }
  0xc5   :  { %2945 = vst [vmem:[#allocation8_spill] sm:$0xff] %v2192_v6  ;;  %v1079_v14 = vcombine.low %v2180_v60, %v2192_v6  ;;  %v535_v9 = vcombine.low %v2178_v59, %v2188_v10 }
  0xc7   :  { %v2216_v3 = vrot.slane %v1079_v14, %v2166_v19  ;;  %v543_v25 = vrot.slane %v535_v9, %v2166_v19 }
  0xc8   :  { %v2204_v20 = vpop.permute.xlu0 %233  ;;  %v2206_v22 = vpop.permute.xlu1 %237 }
  0xc9   :  { %2948 = vst [vmem:[#allocation11_spill] sm:$0xff] %v2206_v22  ;;  %v551_v11 = vcombine.low %v2182_v62, %v2204_v20  ;;  %v1095_v23 = vcombine.low %v2184_v63, %v2206_v22  ;;  %2949 = vst [vmem:[#allocation12_spill] sm:$0xff] %v2216_v3 }
  0xcb   :  { %v559_v26 = vrot.slane %v551_v11, %v2166_v19  ;;  %v2221_v27 = vrot.slane %v1095_v23, %v2166_v19 }
  0xcc   :  { %v245_v28 = vpop.permute.xlu0 %244  ;;  %v249_v29 = vpop.permute.xlu1 %248 }
  0xcd   :  { %2950 = vst [vmem:[#allocation13_spill] sm:$0xff] %v2221_v27  ;;  %v599_v30 = vcombine.low %v543_v25, %v559_v26  ;;  %v600_v31 = vcombine.high %v543_v25, %v559_v26  ;;  %v1143_v5 = vcombine.low %v2216_v3, %v2221_v27 }
  0xcf   :  { %v2231_v33 = vrot.slane %v599_v30, %v2213_v1  ;;  %v2237_v34 = vrot.slane %v600_v31, %v2213_v1  ;;  %v2243_v38 = vrot.slane %v1143_v5, %v2213_v1 }
  0xd0   :  { %v256_v35 = vpop.permute.xlu0 %255  ;;  %v260_v36 = vpop.permute.xlu1 %259 }
  0xd1   :  { %2952 = vst [vmem:[#allocation15_spill] sm:$0xff] %v2243_v38  ;;  %v632_v39 = vcombine.high %v2228_v32, %v2231_v33 }
  0xd3   :  { %1595 = vrot.lane.b32.xlu0 %v632_v39, %s1930_s13 }
  0xd4   :  { %v267_v43 = vpop.permute.xlu0 %266  ;;  %v271_v44 = vpop.permute.xlu1 %270 }
  0xd5   :  { %v639_v47 = vcombine.low %v245_v28, %v267_v43  ;;  %v640_v7 = vcombine.high %v245_v28, %v267_v43  ;;  %v1183_v8 = vcombine.low %v249_v29, %v271_v44  ;;  %v1184_v12 = vcombine.high %v249_v29, %v271_v44 }
  0xd7   :  { %v647_v54 = vrot.slane %v639_v47, %v2166_v19  ;;  %v654_v24 = vrot.slane %v640_v7, %v2166_v19  ;;  %v1191_v25 = vrot.slane %v1183_v8, %v2166_v19  ;;  %v1198_v26 = vrot.slane %v1184_v12, %v2166_v19 }
  0xd8   :  { %v278_v48 = vpop.permute.xlu0 %277  ;;  %v282_v17 = vpop.permute.xlu1 %281 }
  0xd9   :  { %v655_v51 = vcombine.low %v256_v35, %v278_v48  ;;  %v656_v57 = vcombine.high %v256_v35, %v278_v48  ;;  %v1199_v2 = vcombine.low %v260_v36, %v282_v17  ;;  %v1200_v14 = vcombine.high %v260_v36, %v282_v17 }
  0xdb   :  { %v663_v21 = vrot.slane %v655_v51, %v2166_v19  ;;  %v670_v9 = vrot.slane %v656_v57, %v2166_v19  ;;  %v1207_v0 = vrot.slane %v1199_v2, %v2166_v19  ;;  %v1214_v30 = vrot.slane %v1200_v14, %v2166_v19 }
  0xdc   :  { %v289_v58 = vpop.permute.xlu0 %288  ;;  %v293_v61 = vpop.permute.xlu1 %292 }
  0xdd   :  { %v704_v4 = vcombine.high %v647_v54, %v663_v21  ;;  %v703_v31 = vcombine.low %v647_v54, %v663_v21  ;;  %v719_v28 = vcombine.low %v654_v24, %v670_v9  ;;  %v720_v5 = vcombine.high %v654_v24, %v670_v9 }
  0xde   :  { %v1247_v47 = vcombine.low %v1191_v25, %v1207_v0  ;;  %v1248_v48 = vcombine.high %v1191_v25, %v1207_v0  ;;  %v1263_v17 = vcombine.low %v1198_v26, %v1214_v30  ;;  %v1264_v51 = vcombine.high %v1198_v26, %v1214_v30 }
  0xdf   :  { %v2265_v57 = vrot.slane %v719_v28, %v2213_v1  ;;  %v2268_v7 = vrot.slane %v720_v5, %v2213_v1  ;;  %v2271_v54 = vrot.slane %v703_v31, %v2213_v1  ;;  %v2274_v12 = vrot.slane %v704_v4, %v2213_v1 }
  0xe0   :  { %v300_v11 = vpop.permute.xlu0 %299  ;;  %v304_v23 = vpop.permute.xlu1 %303  ;;  %v2291_v28 = vrot.slane %v1263_v17, %v2213_v1  ;;  %v2294_v5 = vrot.slane %v1264_v51, %v2213_v1 }
  0xe1   :  { %2953 = vst [vmem:[#allocation16_spill] sm:$0xff] %v2268_v7  ;;  %2954 = vst [vmem:[#allocation17_spill] sm:$0xff] %v2271_v54 }
  0xe2   :  { %2955 = vst [vmem:[#allocation18_spill] sm:$0xff] %v2291_v28  ;;  %2956 = vst [vmem:[#allocation19_spill] sm:$0xff] %v2294_v5 }
  0xe4   :  { %v311_v29 = vpop.permute.xlu0 %310  ;;  %v315_v35 = vpop.permute.xlu1 %314 }
  0xe5   :  { %v672_v36 = vcombine.high %v289_v58, %v311_v29  ;;  %v1215_v39 = vcombine.low %v293_v61, %v315_v35  ;;  %v1216_v43 = vcombine.high %v293_v61, %v315_v35  ;;  %v671_v44 = vcombine.low %v289_v58, %v311_v29 }
  0xe7   :  { %v679_v9 = vrot.slane %v671_v44, %v2166_v19  ;;  %v686_v24 = vrot.slane %v672_v36, %v2166_v19  ;;  %v1223_v25 = vrot.slane %v1215_v39, %v2166_v19  ;;  %v1230_v26 = vrot.slane %v1216_v43, %v2166_v19 }
  0xe8   :  { %v322_v8 = vpop.permute.xlu0 %321  ;;  %v326_v21 = vpop.permute.xlu1 %325 }
  0xe9   :  { %v687_v61 = vcombine.low %v300_v11, %v322_v8  ;;  %v688_v58 = vcombine.high %v300_v11, %v322_v8  ;;  %v1231_v2 = vcombine.low %v304_v23, %v326_v21  ;;  %v1232_v14 = vcombine.high %v304_v23, %v326_v21 }
  0xea   :  { %v2285_v11 = vrot.slane %v1247_v47, %v2213_v1  ;;  %v2288_v23 = vrot.slane %v1248_v48, %v2213_v1 }
  0xeb   :  { %v695_v0 = vrot.slane %v687_v61, %v2166_v19  ;;  %v702_v30 = vrot.slane %v688_v58, %v2166_v19  ;;  %v1239_v31 = vrot.slane %v1231_v2, %v2166_v19  ;;  %v1246_v4 = vrot.slane %v1232_v14, %v2166_v19 }
  0xec   :  { %v2296_v29 = vpop.permute.xlu0 %332  ;;  %v337_v35 = vpop.permute.xlu1 %336 }
  0xed   :  { %v735_v36 = vcombine.low %v679_v9, %v695_v0  ;;  %v736_v39 = vcombine.high %v679_v9, %v695_v0  ;;  %v751_v43 = vcombine.low %v686_v24, %v702_v30  ;;  %v752_v44 = vcombine.high %v686_v24, %v702_v30 }
  0xee   :  { %v1279_v8 = vcombine.low %v1223_v25, %v1239_v31  ;;  %v1280_v21 = vcombine.high %v1223_v25, %v1239_v31  ;;  %v1295_v47 = vcombine.low %v1230_v26, %v1246_v4  ;;  %v1296_v61 = vcombine.high %v1230_v26, %v1246_v4 }
  0xef   :  { %v2299_v48 = vrot.slane %v751_v43, %v2213_v1  ;;  %v2302_v17 = vrot.slane %v752_v44, %v2213_v1  ;;  %v2305_v51 = vrot.slane %v735_v36, %v2213_v1  ;;  %v2308_v58 = vrot.slane %v736_v39, %v2213_v1 }
  0xf0   :  { %v2310_v2 = vpop.permute.xlu0 %343  ;;  %v2313_v14 = vrot.slane %v1279_v8, %v2213_v1  ;;  %v2316_v9 = vrot.slane %v1280_v21, %v2213_v1  ;;  %v2319_v24 = vrot.slane %v1295_v47, %v2213_v1  ;;  %v2322_v25 = vrot.slane %v1296_v61, %v2213_v1  ;;  %v348_v26 = vpop.permute.xlu1 %347 }
  0xf1   :  { %2957 = vst [vmem:[#allocation20_spill] sm:$0xff] %v2302_v17  ;;  %2958 = vst [vmem:[#allocation21_spill] sm:$0xff] %v2305_v51  ;;  %v768_v0 = vcombine.high %v2271_v54, %v2305_v51 }
  0xf2   :  { %2959 = vst [vmem:[#allocation22_spill] sm:$0xff] %v2319_v24  ;;  %2960 = vst [vmem:[#allocation23_spill] sm:$0xff] %v2322_v25 }
  0xf3   :  { %1597 = vrot.lane.b32.xlu1 %v768_v0, %s1930_s13 }
  0xf4   :  { %v2349_v46 = vpop.permute.xlu0 %354  ;;  %v359_v43 = vpop.permute.xlu1 %358 }
  0xf5   :  { %v1319_v4 = vcombine.low %v337_v35, %v359_v43  ;;  %v1320_v47 = vcombine.high %v337_v35, %v359_v43 }
  0xf7   :  { %v1327_v36 = vrot.slane %v1319_v4, %v2166_v19  ;;  %v1334_v44 = vrot.slane %v1320_v47, %v2166_v19  ;;  %v775_v4 = vcombine.low %v2296_v29, %v2349_v46 }
  0xf8   :  { %v2359_v39 = vpop.permute.xlu0 %365  ;;  %v370_v61 = vpop.permute.xlu1 %369 }
  0xf9   :  { %v1335_v42 = vcombine.low %v348_v26, %v370_v61  ;;  %v1336_v31 = vcombine.high %v348_v26, %v370_v61  ;;  %v791_v26 = vcombine.low %v2310_v2, %v2359_v39 }
  0xfb   :  { %v1343_v30 = vrot.slane %v1335_v42, %v2166_v19  ;;  %v1350_v0 = vrot.slane %v1336_v31, %v2166_v19  ;;  %v799_v51 = vrot.slane %v791_v26, %v2166_v19 }
  0xfc   :  { %v2365_v41 = vpop.permute.xlu0 %376  ;;  %v381_v8 = vpop.permute.xlu1 %380 }
  0xfd   :  { %v1383_v40 = vcombine.low %v1327_v36, %v1343_v30  ;;  %v1384_v21 = vcombine.high %v1327_v36, %v1343_v30  ;;  %v1399_v25 = vcombine.low %v1334_v44, %v1350_v0  ;;  %v1400_v35 = vcombine.high %v1334_v44, %v1350_v0 }
  0xfe   :  { %v783_v36 = vrot.slane %v775_v4, %v2166_v19 }
  0xff   :  { %v2394_v7 = vrot.slane %v1383_v40, %v2213_v1 }
 0x100   :  { %v2367_v43 = vpop.permute.xlu0 %387  ;;  %v392_v5 = vpop.permute.xlu1 %391  ;;  %v839_v3 = vcombine.low %v783_v36, %v799_v51 }
 0x101   :  { %2961 = vst [vmem:[#allocation24_spill] sm:$0xff] %v2394_v7 }
 0x104   :  { %v2373_v47 = vpop.permute.xlu0 %398  ;;  %v403_v42 = vpop.permute.xlu1 %402 }
 0x105   :  { %v1351_v31 = vcombine.low %v381_v8, %v403_v42  ;;  %v1352_v61 = vcombine.high %v381_v8, %v403_v42  ;;  %v807_v30 = vcombine.low %v2365_v41, %v2373_v47 }
 0x107   :  { %v1359_v27 = vrot.slane %v1351_v31, %v2166_v19  ;;  %v1366_v8 = vrot.slane %v1352_v61, %v2166_v19  ;;  %v815_v26 = vrot.slane %v807_v30, %v2166_v19 }
 0x108   :  { %v2379_v44 = vpop.permute.xlu0 %409  ;;  %v414_v0 = vpop.permute.xlu1 %413 }
 0x109   :  { %v823_v54 = vcombine.low %v2367_v43, %v2379_v44  ;;  %v1367_v37 = vcombine.low %v392_v5, %v414_v0  ;;  %v1368_v38 = vcombine.high %v392_v5, %v414_v0  ;;  %v2397_v5 = vrot.slane %v1384_v21, %v2213_v1 }
 0x10b   :  { %v831_v42 = vrot.slane %v823_v54, %v2166_v19  ;;  %v1375_v16 = vrot.slane %v1367_v37, %v2166_v19  ;;  %v1382_v4 = vrot.slane %v1368_v38, %v2166_v19  ;;  %2962 = vst [vmem:[#allocation25_spill] sm:$0xff] %v2397_v5  ;;  %v2400_v54 = vrot.slane %v1399_v25, %v2213_v1 }
 0x10c   :  { %v2389_v18 = vpop.permute.xlu0 %420  ;;  %v2391_v17 = vpop.permute.xlu1 %424  ;;  %v2403_v37 = vrot.slane %v1400_v35, %v2213_v1  ;;  %v2406_v38 = vrot.slane %v839_v3, %v2213_v1 }
 0x10d   :  { %v871_v31 = vcombine.low %v815_v26, %v831_v42  ;;  %v1415_v61 = vcombine.low %v1359_v27, %v1375_v16  ;;  %v1416_v0 = vcombine.high %v1359_v27, %v1375_v16  ;;  %v1431_v30 = vcombine.low %v1366_v8, %v1382_v4  ;;  %2963 = vst [vmem:[#allocation26_spill] sm:$0xff] %v2400_v54 }
 0x10e   :  { %v1432_v24 = vcombine.high %v1366_v8, %v1382_v4  ;;  %2964 = vst [vmem:[#allocation27_spill] sm:$0xff] %v2403_v37  ;;  %2965 = vst [vmem:[#allocation28_spill] sm:$0xff] %v2406_v38  ;;  %v872_v3 = vcombine.high %v815_v26, %v831_v42  ;;  %v536_v4 = vcombine.high %v2178_v59, %v2188_v10 }
 0x10f   :  { %v2409_v40 = vrot.slane %v871_v31, %v2213_v1  ;;  %v2414_v21 = vrot.slane %v1415_v61, %v2213_v1  ;;  %v2417_v16 = vrot.slane %v1416_v0, %v2213_v1  ;;  %v2420_v27 = vrot.slane %v1431_v30, %v2213_v1 }
 0x110   :  { %v2411_v28 = vpop.permute.xlu0 %431  ;;  %v2423_v25 = vrot.slane %v1432_v24, %v2213_v1  ;;  %v2425_v35 = vpop.permute.xlu1 %435  ;;  %v840_v61 = vcombine.high %v783_v36, %v799_v51  ;;  %v552_v24 = vcombine.high %v2182_v62, %v2204_v20  ;;  %v886_v26 = vrot.slane %v872_v3, %v2213_v1 }
 0x111   :  { %2966 = vst [vmem:[#allocation29_spill] sm:$0xff] %v2409_v40  ;;  %2967 = vst [vmem:[#allocation30_spill] sm:$0xff] %v2414_v21  ;;  %v904_v8 = vcombine.high %v2406_v38, %v2409_v40  ;;  %v520_v0 = vcombine.high %v2155_v49, %v2170_v55  ;;  %v2971_v36 = vcombine.low %v2234_v13, %v2237_v34 }
 0x112   :  { %2968 = vst [vmem:[#allocation31_spill] sm:$0xff] %v2417_v16  ;;  %2969 = vst [vmem:[#allocation32_spill] sm:$0xff] %v2420_v27  ;;  %v854_v31 = vrot.slane %v840_v61, %v2213_v1  ;;  %v504_v62 = vcombine.high %v2149_v15, %v2161_v52  ;;  %v2471_v20 = vrot.slane %v552_v24, %v2166_v19 }
 0x113   :  { %2970 = vst [vmem:[#allocation33_spill] sm:$0xff] %v2423_v25  ;;  %1599 = vrot.lane.b32.xlu0 %v904_v8, %s1930_s13  ;;  %v824_v49 = vcombine.high %v2367_v43, %v2379_v44  ;;  %v2476_v59 = vrot.slane %v520_v0, %v2166_v19  ;;  %v550_v10 = vrot.slane %v536_v4, %v2166_v19 }
 0x114   :  { %v2440_v42 = vpop.permute.xlu0 %442  ;;  %v2442_v30 = vpop.permute.xlu1 %446  ;;  %v905_v55 = vcombine.low %v854_v31, %v886_v26  ;;  %v792_v3 = vcombine.high %v2310_v2, %v2359_v39  ;;  %v808_v61 = vcombine.high %v2365_v41, %v2373_v47  ;;  %v518_v43 = vrot.slane %v504_v62, %v2166_v19 }
 0x115   :  { %v615_v44 = vcombine.low %v550_v10, %v2471_v20  ;;  %v776_v0 = vcombine.high %v2296_v29, %v2349_v46  ;;  %v2493_v4 = vrot.slane %v824_v49, %v2166_v19  ;;  %v2972_v47 = vcombine.high %v2234_v13, %v2237_v34 }
 0x116   :  { %v583_v2 = vcombine.low %v518_v43, %v2476_v59  ;;  %v2497_v41 = vrot.slane %v792_v3, %v2166_v19  ;;  %v822_v39 = vrot.slane %v808_v61, %v2166_v19  ;;  %v906_v62 = vcombine.high %v854_v31, %v886_v26 }
 0x117   :  { %1611 = vrot.lane.b32.xlu0 %v2971_v36, %s1931_s18  ;;  %v790_v46 = vrot.slane %v776_v0, %v2166_v19  ;;  %v623_v49 = vrot.slane %v615_v44, %v2213_v1  ;;  %v911_v34 = vcombine.low %v2389_v18, %v2440_v42  ;;  %v616_v63 = vcombine.high %v550_v10, %v2471_v20 }
 0x118   :  { %v2464_v51 = vpop.permute.xlu0 %453  ;;  %v2466_v8 = vpop.permute.xlu1 %457  ;;  %v887_v29 = vcombine.low %v822_v39, %v2493_v4  ;;  %v591_v13 = vrot.slane %v583_v2, %v2213_v1  ;;  %v584_v6 = vcombine.high %v518_v43, %v2476_v59 }
 0x119   :  { %v855_v3 = vcombine.low %v790_v46, %v2497_v41  ;;  %v856_v10 = vcombine.high %v790_v46, %v2497_v41 }
 0x11a   :  { %v895_v31 = vrot.slane %v887_v29, %v2213_v1  ;;  %v635_v26 = vcombine.low %v591_v13, %v623_v49  ;;  %v919_v29 = vrot.slane %v911_v34, %v2166_v19  ;;  %v636_v60 = vcombine.high %v591_v13, %v623_v49 }
 0x11b   :  { %1615 = vrot.lane.b32.xlu0 %v905_v55, %s1931_s18  ;;  %v927_v55 = vcombine.low %v2411_v28, %v2464_v51  ;;  %v863_v2 = vrot.slane %v855_v3, %v2213_v1  ;;  %v2973_v49 = vcombine.low %v2274_v12, %v2308_v58 }
 0x11c   :  { %v2484_v15 = vpop.permute.xlu0 %464  ;;  %v2486_v52 = vpop.permute.xlu1 %468 }
 0x11d   :  { %v935_v44 = vrot.slane %v927_v55, %v2166_v19  ;;  %v907_v25 = vcombine.low %v863_v2, %v895_v31  ;;  %v908_v20 = vcombine.high %v863_v2, %v895_v31 }
 0x11f   :  { %1627 = vrot.lane.b32.xlu0 %v2972_v47, %s1932_s0  ;;  %v1455_v47 = vcombine.low %v2391_v17, %v2442_v30  ;;  %v975_v3 = vcombine.low %v919_v29, %v935_v44  ;;  %v976_v43 = vcombine.high %v919_v29, %v935_v44  ;;  %v912_v29 = vcombine.high %v2389_v18, %v2440_v42 }
 0x120   :  { %v2504_v24 = vpop.permute.xlu0 %475  ;;  %v2506_v36 = vpop.permute.xlu1 %479 }
 0x121   :  { %v1463_v16 = vrot.slane %v1455_v47, %v2166_v19  ;;  %v2551_v47 = vrot.slane %v975_v3, %v2213_v1  ;;  %v990_v46 = vrot.slane %v976_v43, %v2213_v1  ;;  %v2624_v42 = vrot.slane %v912_v29, %v2166_v19 }
 0x123   :  { %1631 = vrot.lane.b32.xlu0 %v906_v62, %s1932_s0  ;;  %v1471_v62 = vcombine.low %v2425_v35, %v2466_v8 }
 0x124   :  { %v2518_v61 = vpop.permute.xlu0 %486  ;;  %v2520_v0 = vpop.permute.xlu1 %490 }
 0x125   :  { %v943_v40 = vcombine.low %v2484_v15, %v2518_v61  ;;  %v1487_v38 = vcombine.low %v2486_v52, %v2520_v0  ;;  %v1479_v5 = vrot.slane %v1471_v62, %v2166_v19  ;;  %v928_v62 = vcombine.high %v2411_v28, %v2464_v51 }
 0x126   :  { %v944_v2 = vcombine.high %v2484_v15, %v2518_v61  ;;  %v2974_v28 = vcombine.high %v2285_v11, %v2313_v14  ;;  %v2975_v51 = vcombine.high %v2274_v12, %v2308_v58 }
 0x127   :  { %1643 = vrot.lane.b32.xlu0 %v635_v26, %s1933_s19  ;;  %v951_v26 = vrot.slane %v943_v40, %v2166_v19  ;;  %v1495_v34 = vrot.slane %v1487_v38, %v2166_v19  ;;  %v1519_v50 = vcombine.low %v1463_v16, %v1479_v5  ;;  %v2557_v38 = vrot.slane %v616_v63, %v2213_v1 }
 0x128   :  { %v498_v27 = vpop.permute.xlu0 %497  ;;  %v2535_v55 = vpop.permute.xlu1 %501  ;;  %v1520_v15 = vcombine.high %v1463_v16, %v1479_v5  ;;  %v2976_v5 = vcombine.low %v2228_v32, %v2231_v33  ;;  %v1472_v32 = vcombine.high %v2425_v35, %v2466_v8  ;;  %v1488_v33 = vcombine.high %v2486_v52, %v2520_v0 }
 0x129   :  { %v959_v54 = vcombine.low %v2504_v24, %v498_v27  ;;  %v1503_v37 = vcombine.low %v2506_v36, %v2535_v55  ;;  %v960_v13 = vcombine.high %v2504_v24, %v498_v27  ;;  %v2608_v27 = vrot.slane %v928_v62, %v2166_v19  ;;  %v2985_v62 = vld [vmem:[#allocation7_spill] sm:$0xff] }
 0x12a   :  { %v2611_v24 = vrot.slane %v944_v2, %v2166_v19  ;;  %v1534_v12 = vrot.slane %v1520_v15, %v2213_v1  ;;  %v1504_v43 = vcombine.high %v2506_v36, %v2535_v55  ;;  %v2667_v35 = vrot.slane %v1488_v33, %v2166_v19 }
 0x12b   :  { %v967_v21 = vrot.slane %v959_v54, %v2166_v19  ;;  %1647 = vrot.lane.b32.xlu0 %v907_v25, %s1933_s19  ;;  %v1511_v7 = vrot.slane %v1503_v37, %v2166_v19  ;;  %v888_v37 = vcombine.high %v822_v39, %v2493_v4  ;;  %v2585_v39 = vrot.slane %v856_v10, %v2213_v1 }
 0x12c   :  { %v2605_v3 = vrot.slane %v960_v13, %v2166_v19  ;;  %v1456_v10 = vcombine.high %v2391_v17, %v2442_v30  ;;  %v2664_v17 = vrot.slane %v1472_v32, %v2166_v19  ;;  %v2670_v30 = vrot.slane %v1504_v43, %v2166_v19 }
 0x12d   :  { %v1007_v22 = vcombine.low %v951_v26, %v967_v21  ;;  %v1551_v40 = vcombine.low %v1495_v34, %v1511_v7  ;;  %v1008_v25 = vcombine.high %v951_v26, %v967_v21  ;;  %v2577_v4 = vrot.slane %v888_v37, %v2213_v1 }
 0x12e   :  { %v1023_v61 = vcombine.low %v2611_v24, %v2605_v3  ;;  %v1552_v26 = vcombine.high %v1495_v34, %v1511_v7  ;;  %v991_v37 = vcombine.low %v2624_v42, %v2608_v27  ;;  %v2977_v34 = vcombine.low %v2288_v23, %v2316_v9 }
 0x12f   :  { %1659 = vrot.lane.b32.xlu0 %v636_v60, %s1934_s20  ;;  %v2554_v54 = vrot.slane %v1007_v22, %v2213_v1  ;;  %v2564_v60 = vrot.slane %v584_v6, %v2213_v1  ;;  %v2567_v22 = vrot.slane %v1519_v50, %v2213_v1  ;;  %v2572_v63 = vrot.slane %v1551_v40, %v2213_v1 }
 0x130   :  { %v1022_v6 = vrot.slane %v1008_v25, %v2213_v1  ;;  %v909_v31 = vcombine.low %v2585_v39, %v2577_v4  ;;  %v1031_v58 = vrot.slane %v1023_v61, %v2213_v1  ;;  %v1566_v25 = vrot.slane %v1552_v26, %v2213_v1 }
 0x131   :  { %v1040_v59 = vcombine.high %v2551_v47, %v2554_v54  ;;  %v1039_v21 = vcombine.low %v2551_v47, %v2554_v54  ;;  %v637_v41 = vcombine.low %v2564_v60, %v2557_v38  ;;  %v1583_v50 = vcombine.low %v2567_v22, %v2572_v63 }
 0x132   :  { %v1041_v44 = vcombine.low %v990_v46, %v1022_v6  ;;  %v1584_v18 = vcombine.high %v2567_v22, %v2572_v63  ;;  %v1042_v40 = vcombine.high %v990_v46, %v1022_v6  ;;  %v999_v16 = vrot.slane %v991_v37, %v2213_v1  ;;  %v2993_v37 = vld [vmem:[#allocation9_spill] sm:$0xff] }
 0x133   :  { %1663 = vrot.lane.b32.xlu0 %v908_v20, %s1934_s20  ;;  %1601 = vrot.lane.b32.xlu1 %v1040_v59, %s1930_s13  ;;  %v2978_v59 = vcombine.low %v2265_v57, %v2299_v48  ;;  %v1585_v6 = vcombine.low %v1534_v12, %v1566_v25  ;;  %v2661_v46 = vrot.slane %v1456_v10, %v2166_v19  ;;  %v2997_v10 = vld [vmem:[#allocation14_spill] sm:$0xff] }
 0x134   :  { %v2979_v8 = vcombine.high %v2288_v23, %v2316_v9  ;;  %v2980_v52 = vcombine.high %v2265_v57, %v2299_v48  ;;  %v1567_v0 = vcombine.low %v2667_v35, %v2670_v30  ;;  %v1586_v55 = vcombine.high %v1534_v12, %v1566_v25  ;;  %v2981_v9 = vld [vmem:[#allocation5_spill] sm:$0xff]  ;;  %v2982_v57 = vld [vmem:[#allocation8_spill] sm:$0xff]  ;;  %v2983_v48 = vld [vmem:[#allocation6_spill] sm:$0xff] }
 0x135   :  { %v1535_v36 = vcombine.low %v2661_v46, %v2664_v17  ;;  %v1048_v23 = vcombine.high %v2151_v45, %v2163_v53  ;;  %v1064_v13 = vcombine.high %v2981_v9, %v2172_v56  ;;  %v2989_v45 = vld [vmem:[#allocation16_spill] sm:$0xff] }
 0x136   :  { %v2990_v53 = vld [vmem:[#allocation20_spill] sm:$0xff] }
 0x137   :  { %1675 = vrot.lane.b32.xlu0 %v637_v41, %s1935_s21  ;;  %1613 = vrot.lane.b32.xlu1 %v2973_v49, %s1931_s18  ;;  %v1043_v41 = vcombine.low %v999_v16, %v1031_v58  ;;  %v1044_v49 = vcombine.high %v999_v16, %v1031_v58  ;;  %v1543_v29 = vrot.slane %v1535_v36, %v2213_v1 }
 0x138   :  { %v2991_v61 = vcombine.low %v2989_v45, %v2990_v53  ;;  %v1062_v56 = vrot.slane %v1048_v23, %v2166_v19  ;;  %v1078_v26 = vrot.slane %v1064_v13, %v2166_v19 }
 0x13a   :  { %v1128_v33 = vcombine.high %v1062_v56, %v1078_v26 }
 0x13b   :  { %1679 = vrot.lane.b32.xlu0 %v909_v31, %s1935_s21  ;;  %1617 = vrot.lane.b32.xlu1 %v1041_v44, %s1931_s18  ;;  %v1080_v31 = vcombine.high %v2983_v48, %v2982_v57  ;;  %v2984_v44 = vld [vmem:[#allocation11_spill] sm:$0xff]  ;;  %v3002_v57 = vld [vmem:[#allocation17_spill] sm:$0xff] }
 0x13c   :  { %v1096_v2 = vcombine.high %v2985_v62, %v2984_v44  ;;  %v3003_v48 = vld [vmem:[#allocation21_spill] sm:$0xff] }
 0x13d   :  { %v1094_v58 = vrot.slane %v1080_v31, %v2166_v19  ;;  %v3004_v31 = vcombine.low %v3002_v57, %v3003_v48  ;;  %v3005_v62 = vld [vmem:[#allocation25_spill] sm:$0xff] }
 0x13e   :  { %v1110_v25 = vrot.slane %v1096_v2, %v2166_v19  ;;  %v3006_v2 = vld [vmem:[#allocation31_spill] sm:$0xff] }
 0x13f   :  { %1709 = vrot.lane.b32.xlu0 %v2974_v28, %s1930_s13  ;;  %1629 = vrot.lane.b32.xlu1 %v2975_v51, %s1932_s0  ;;  %v1575_v28 = vrot.slane %v1567_v0, %v2213_v1  ;;  %v2986_v51 = vld [vmem:[#allocation18_spill] sm:$0xff] }
 0x140   :  { %v1160_v43 = vcombine.high %v1094_v58, %v1110_v25 }
 0x141   :  { %v1588_v0 = vcombine.high %v1543_v29, %v1575_v28 }
 0x142   :  { %v1174_v23 = vrot.slane %v1160_v43, %v2213_v1 }
 0x143   :  { %1713 = vrot.lane.b32.xlu0 %v1584_v18, %s1930_s13  ;;  %1633 = vrot.lane.b32.xlu1 %v1042_v40, %s1932_s0  ;;  %v2987_v18 = vld [vmem:[#allocation22_spill] sm:$0xff] }
 0x144   :  { %v2988_v15 = vcombine.low %v2986_v51, %v2987_v18  ;;  %v2992_v40 = vld [vmem:[#allocation10_spill] sm:$0xff]  ;;  %v2998_v19 = vcombine.high %v2986_v51, %v2987_v18  ;;  %v1159_v51 = vcombine.low %v1094_v58, %v1110_v25  ;;  %v3013_v25 = vld [vmem:[#allocation32_spill] sm:$0xff] }
 0x145   :  { %v1596_v20 = vpop.permute.xlu0 %1595  ;;  %v1112_v12 = vcombine.high %v2993_v37, %v2992_v40  ;;  %v638_v37 = vcombine.high %v2564_v60, %v2557_v38  ;;  %v3012_v60 = vld [vmem:[#allocation26_spill] sm:$0xff] }
 0x146   :  { %v2639_v7 = vsel %vm108_vm0, %v2976_v5, %v1596_v20  ;;  %v2994_v20 = vld [vmem:[#allocation13_spill] sm:$0xff]  ;;  %v2995_v5 = vld [vmem:[#allocation12_spill] sm:$0xff]  ;;  %v3016_v43 = vcombine.high %v3012_v60, %v3013_v25 }
 0x147   :  { %1725 = vrot.lane.b32.xlu0 %v2977_v34, %s1931_s18  ;;  %1645 = vrot.lane.b32.xlu1 %v2978_v59, %s1933_s19  ;;  %v1144_v16 = vcombine.high %v2995_v5, %v2994_v20  ;;  %v1587_v34 = vcombine.low %v1543_v29, %v1575_v28  ;;  %v2996_v59 = vld [vmem:[#allocation15_spill] sm:$0xff]  ;;  %v3007_v29 = vcombine.low %v3005_v62, %v3006_v2 }
 0x148   :  { %v1176_v32 = vcombine.high %v2997_v10, %v2996_v59  ;;  %v1127_v28 = vcombine.low %v1062_v56, %v1078_v26  ;;  %v1167_v20 = vrot.slane %v1159_v51, %v2213_v1  ;;  %v3011_v56 = vcombine.high %v3005_v62, %v3006_v2 }
 0x149   :  { %v910_v26 = vcombine.high %v2585_v39, %v2577_v4  ;;  %v3014_v5 = vcombine.low %v3012_v60, %v3013_v25  ;;  %v992_v4 = vcombine.high %v2624_v42, %v2608_v27  ;;  %v1568_v27 = vcombine.high %v2667_v35, %v2670_v30 }
 0x14b   :  { %1729 = vrot.lane.b32.xlu0 %v1585_v6, %s1931_s18  ;;  %1649 = vrot.lane.b32.xlu1 %v1043_v41, %s1933_s19  ;;  %v1126_v6 = vrot.slane %v1112_v12, %v2213_v1  ;;  %v1158_v41 = vrot.slane %v1144_v16, %v2213_v1  ;;  %v1135_v12 = vrot.slane %v1127_v28, %v2213_v1 }
 0x14c   :  { %v1024_v16 = vcombine.high %v2611_v24, %v2605_v3  ;;  %v1536_v3 = vcombine.high %v2661_v46, %v2664_v17 }
 0x14d   :  { %v1178_v18 = vcombine.high %v1126_v6, %v1158_v41  ;;  %v1179_v58 = vcombine.low %v1135_v12, %v1167_v20 }
 0x14e   :  { %v1550_v42 = vrot.slane %v1536_v3, %v2213_v1 }
 0x14f   :  { %1741 = vrot.lane.b32.xlu0 %v2979_v8, %s1932_s0  ;;  %1661 = vrot.lane.b32.xlu1 %v2980_v52, %s1934_s20  ;;  %v2999_v8 = vld [vmem:[#allocation24_spill] sm:$0xff]  ;;  %v3000_v52 = vld [vmem:[#allocation30_spill] sm:$0xff] }
 0x150   :  { %v3001_v36 = vcombine.high %v2999_v8, %v3000_v52 }
 0x153   :  { %1745 = vrot.lane.b32.xlu0 %v1586_v55, %s1932_s0  ;;  %1665 = vrot.lane.b32.xlu1 %v1044_v49, %s1934_s20  ;;  %v1177_v55 = vcombine.low %v1126_v6, %v1158_v41  ;;  %v1142_v49 = vrot.slane %v1128_v33, %v2213_v1  ;;  %v1006_v33 = vrot.slane %v992_v4, %v2213_v1 }
 0x154   :  { %v1582_v6 = vrot.slane %v1568_v27, %v2213_v1 }
 0x155   :  { %v1181_v13 = vcombine.low %v1142_v49, %v1174_v23  ;;  %v1182_v38 = vcombine.high %v1142_v49, %v1174_v23  ;;  %v3020_v49 = vld [vmem:[#allocation19_spill] sm:$0xff] }
 0x156   :  { %v3021_v23 = vld [vmem:[#allocation23_spill] sm:$0xff]  ;;  %v1589_v35 = vcombine.low %v1550_v42, %v1582_v6  ;;  %v1590_v28 = vcombine.high %v1550_v42, %v1582_v6 }
 0x157   :  { %1757 = vrot.lane.b32.xlu0 %v2988_v15, %s1933_s19  ;;  %1677 = vrot.lane.b32.xlu1 %v2991_v61, %s1935_s21  ;;  %v3008_v15 = vld [vmem:[#allocation27_spill] sm:$0xff]  ;;  %v3009_v61 = vld [vmem:[#allocation33_spill] sm:$0xff]  ;;  %v3022_v46 = vcombine.low %v3020_v49, %v3021_v23 }
 0x158   :  { %v3010_v40 = vcombine.low %v3008_v15, %v3009_v61  ;;  %v3015_v39 = vcombine.high %v3008_v15, %v3009_v61 }
 0x15b   :  { %1761 = vrot.lane.b32.xlu0 %v1587_v34, %s1933_s19  ;;  %1707 = vrot.lane.b32.xlu1 %v1176_v32, %s1930_s13  ;;  %v1180_v34 = vcombine.high %v1135_v12, %v1167_v20  ;;  %v1038_v32 = vrot.slane %v1024_v16, %v2213_v1 }
 0x15d   :  { %v1045_v24 = vcombine.low %v1006_v33, %v1038_v32  ;;  %v1046_v48 = vcombine.high %v1006_v33, %v1038_v32 }
 0x15f   :  { %1773 = vrot.lane.b32.xlu0 %v2998_v19, %s1934_s20  ;;  %1711 = vrot.lane.b32.xlu1 %v3001_v36, %s1930_s13  ;;  %v3017_v19 = vld [vmem:[#allocation28_spill] sm:$0xff]  ;;  %v3018_v36 = vld [vmem:[#allocation29_spill] sm:$0xff] }
 0x163   :  { %1777 = vrot.lane.b32.xlu0 %v1588_v0, %s1934_s20  ;;  %1723 = vrot.lane.b32.xlu1 %v1177_v55, %s1931_s18  ;;  %v3019_v0 = vcombine.low %v3017_v19, %v3018_v36 }
 0x165   :  { %v1598_v9 = vpop.permute.xlu1 %1597 }
 0x166   :  { %v2734_v44 = vsel %vm108_vm0, %v3004_v31, %v1598_v9 }
 0x167   :  { %1787 = vrot.lane.b32.xlu0 %v1181_v13, %s1935_s21  ;;  %1727 = vrot.lane.b32.xlu1 %v3007_v29, %s1931_s18  ;;  %v3023_v13 = vcombine.high %v2989_v45, %v2990_v53 }
 0x16b   :  { %1791 = vrot.lane.b32.xlu0 %v3010_v40, %s1935_s21  ;;  %1739 = vrot.lane.b32.xlu1 %v1178_v18, %s1932_s0 }
 0x16f   :  { %1691 = vrot.lane.b32.xlu0 %v638_v37, %s1936_s22  ;;  %1743 = vrot.lane.b32.xlu1 %v3011_v56, %s1932_s0 }
 0x173   :  { %1695 = vrot.lane.b32.xlu0 %v910_v26, %s1936_s22  ;;  %1755 = vrot.lane.b32.xlu1 %v1179_v58, %s1933_s19 }
 0x177   :  { %1803 = vrot.lane.b32.xlu0 %v1182_v38, %s1936_s22  ;;  %1759 = vrot.lane.b32.xlu1 %v3014_v5, %s1933_s19  ;;  %v3025_v5 = vcombine.low %v2285_v11, %v2313_v14 }
 0x17b   :  { %1807 = vrot.lane.b32.xlu0 %v3015_v39, %s1936_s22  ;;  %1771 = vrot.lane.b32.xlu1 %v1180_v34, %s1934_s20 }
 0x17f   :  { %1775 = vrot.lane.b32.xlu1 %v3016_v43, %s1934_s20 }
 0x183   :  { %1681 = vrot.lane.b32.xlu1 %v1045_v24, %s1935_s21 }
 0x185   :  { %v1600_v41 = vpop.permute.xlu0 %1599 }
 0x186   :  { %v1817_v55 = vsel %vm108_vm0, %v3019_v0, %v1600_v41 }
 0x187   :  { %1789 = vrot.lane.b32.xlu1 %v3022_v46, %s1935_s21 }
 0x189   :  { %v1612_v17 = vpop.permute.xlu0 %1611 }
 0x18a   :  { %v1819_v30 = vsel %vm113_vm1, %v2639_v7, %v1612_v17  ;;  %v3024_v7 = vcombine.high %v3020_v49, %v3021_v23 }
 0x18b   :  { %1793 = vrot.lane.b32.xlu1 %v1589_v35, %s1935_s21 }
 0x18d   :  { %v1616_v9 = vpop.permute.xlu0 %1615 }
 0x18e   :  { %v1821_v1 = vsel %vm113_vm1, %v1817_v55, %v1616_v9 }
 0x18f   :  { %1693 = vrot.lane.b32.xlu1 %v3023_v13, %s1936_s22 }
 0x191   :  { %v1628_v57 = vpop.permute.xlu0 %1627 }
 0x192   :  { %v1823_v31 = vsel %vm118_vm2, %v1819_v30, %v1628_v57 }
 0x193   :  { %1697 = vrot.lane.b32.xlu1 %v1046_v48, %s1936_s22 }
 0x195   :  { %v1632_v62 = vpop.permute.xlu0 %1631 }
 0x196   :  { %v1825_v2 = vsel %vm118_vm2, %v1821_v1, %v1632_v62 }
 0x197   :  { %1805 = vrot.lane.b32.xlu1 %v3024_v7, %s1936_s22 }
 0x199   :  { %v1644_v29 = vpop.permute.xlu0 %1643 }
 0x19a   :  { %v1827_v51 = vsel %vm123_vm3, %v1823_v31, %v1644_v29 }
 0x19b   :  { %1809 = vrot.lane.b32.xlu1 %v1590_v28, %s1936_s22  ;;  %v3026_v28 = vcombine.low %v2997_v10, %v2996_v59 }
 0x19d   :  { %v1648_v45 = vpop.permute.xlu0 %1647 }
 0x19e   :  { %v1829_v53 = vsel %vm123_vm3, %v1825_v2, %v1648_v45 }
 0x1a1   :  { %v1660_v18 = vpop.permute.xlu0 %1659 }
 0x1a2   :  { %v1831_v30 = vsel %vm128_vm4, %v1827_v51, %v1660_v18 }
 0x1a5   :  { %v1602_v15 = vpop.permute.xlu1 %1601  ;;  %v1664_v61 = vpop.permute.xlu0 %1663 }
 0x1a6   :  { %v1818_v40 = vsel %vm108_vm0, %v1039_v21, %v1602_v15  ;;  %v1833_v48 = vsel %vm128_vm4, %v1829_v53, %v1664_v61 }
 0x1a9   :  { %v1614_v37 = vpop.permute.xlu1 %1613  ;;  %v1676_v12 = vpop.permute.xlu0 %1675 }
 0x1aa   :  { %v1820_v20 = vsel %vm113_vm1, %v2734_v44, %v1614_v37  ;;  %v1835_v9 = vsel %vm133_vm5, %v1831_v30, %v1676_v12 }
 0x1ad   :  { %v1618_v56 = vpop.permute.xlu1 %1617  ;;  %v1680_v26 = vpop.permute.xlu0 %1679 }
 0x1ae   :  { %v1822_v58 = vsel %vm113_vm1, %v1818_v40, %v1618_v56  ;;  %v1837_v31 = vsel %vm133_vm5, %v1833_v48, %v1680_v26  ;;  %v3027_v40 = vcombine.low %v2999_v8, %v3000_v52 }
 0x1b1   :  { %v1630_v38 = vpop.permute.xlu1 %1629  ;;  %v1710_v60 = vpop.permute.xlu0 %1709 }
 0x1b2   :  { %v1824_v25 = vsel %vm118_vm2, %v1820_v20, %v1630_v38  ;;  %v1844_v47 = vsel %vm108_vm0, %v3025_v5, %v1710_v60 }
 0x1b5   :  { %v1634_v54 = vpop.permute.xlu1 %1633  ;;  %v1714_v21 = vpop.permute.xlu0 %1713 }
 0x1b6   :  { %v1826_v16 = vsel %vm118_vm2, %v1822_v58, %v1634_v54  ;;  %v1846_v44 = vsel %vm108_vm0, %v1583_v50, %v1714_v21 }
 0x1b9   :  { %v1646_v34 = vpop.permute.xlu1 %1645  ;;  %v1726_v4 = vpop.permute.xlu0 %1725 }
 0x1ba   :  { %v1828_v39 = vsel %vm123_vm3, %v1824_v25, %v1646_v34  ;;  %v1848_v32 = vsel %vm113_vm1, %v1844_v47, %v1726_v4 }
 0x1bd   :  { %v1650_v33 = vpop.permute.xlu1 %1649  ;;  %v1730_v43 = vpop.permute.xlu0 %1729 }
 0x1be   :  { %v1830_v11 = vsel %vm123_vm3, %v1826_v16, %v1650_v33  ;;  %v1850_v14 = vsel %vm113_vm1, %v1846_v44, %v1730_v43 }
 0x1c1   :  { %v1662_v3 = vpop.permute.xlu1 %1661  ;;  %v1742_v27 = vpop.permute.xlu0 %1741 }
 0x1c2   :  { %v1852_v24 = vsel %vm118_vm2, %v1848_v32, %v1742_v27  ;;  %v1832_v54 = vsel %vm128_vm4, %v1828_v39, %v1662_v3 }
 0x1c5   :  { %v1666_v42 = vpop.permute.xlu1 %1665  ;;  %v1746_v22 = vpop.permute.xlu0 %1745 }
 0x1c6   :  { %v2835_v63 = vsel %vm118_vm2, %v1850_v14, %v1746_v22  ;;  %v1834_v34 = vsel %vm128_vm4, %v1830_v11, %v1666_v42 }
 0x1c9   :  { %v1678_v50 = vpop.permute.xlu1 %1677  ;;  %v1758_v6 = vpop.permute.xlu0 %1757 }
 0x1ca   :  { %v1836_v21 = vsel %vm133_vm5, %v1832_v54, %v1678_v50  ;;  %v1856_v43 = vsel %vm123_vm3, %v1852_v24, %v1758_v6 }
 0x1cd   :  { %v1708_v41 = vpop.permute.xlu1 %1707  ;;  %v2837_v19 = vpop.permute.xlu0 %1761 }
 0x1ce   :  { %v1843_v51 = vsel %vm108_vm0, %v3026_v28, %v1708_v41  ;;  %v1858_v11 = vsel %vm123_vm3, %v2835_v63, %v2837_v19 }
 0x1d1   :  { %v1712_v36 = vpop.permute.xlu1 %1711  ;;  %v1774_v0 = vpop.permute.xlu0 %1773 }
 0x1d2   :  { %v1845_v37 = vsel %vm108_vm0, %v3027_v40, %v1712_v36  ;;  %v1860_v14 = vsel %vm128_vm4, %v1856_v43, %v1774_v0 }
 0x1d5   :  { %v1724_v55 = vpop.permute.xlu1 %1723  ;;  %v1778_v49 = vpop.permute.xlu0 %1777 }
 0x1d6   :  { %v1847_v45 = vsel %vm113_vm1, %v1843_v51, %v1724_v55  ;;  %v1862_v42 = vsel %vm128_vm4, %v1858_v11, %v1778_v49 }
 0x1d9   :  { %v1728_v23 = vpop.permute.xlu1 %1727  ;;  %v1788_v46 = vpop.permute.xlu0 %1787 }
 0x1da   :  { %v1849_v20 = vsel %vm113_vm1, %v1845_v37, %v1728_v23 }
 0x1dd   :  { %v1740_v17 = vpop.permute.xlu1 %1739  ;;  %v1792_v35 = vpop.permute.xlu0 %1791 }
 0x1de   :  { %v1851_v18 = vsel %vm118_vm2, %v1847_v45, %v1740_v17 }
 0x1e1   :  { %v1744_v1 = vpop.permute.xlu1 %1743  ;;  %v1692_v13 = vpop.permute.xlu0 %1691 }
 0x1e2   :  { %v1839_v57 = vsel %vm138_vm6, %v1835_v9, %v1692_v13  ;;  %v1853_v10 = vsel %vm118_vm2, %v1849_v20, %v1744_v1 }
 0x1e3   :  { %1871 = vst [vmem:[#allocation2 + $0x40] sm:$0xff] %v1839_v57 }
 0x1e5   :  { %v1756_v62 = vpop.permute.xlu1 %1755  ;;  %v1696_v2 = vpop.permute.xlu0 %1695 }
 0x1e6   :  { %v1841_v7 = vsel %vm138_vm6, %v1837_v31, %v1696_v2  ;;  %v1855_v15 = vsel %vm123_vm3, %v1851_v18, %v1756_v62 }
 0x1e7   :  { %1875 = vst [vmem:[#allocation2 + $0x60] sm:$0xff] %v1841_v7 }
 0x1e9   :  { %v1760_v29 = vpop.permute.xlu1 %1759  ;;  %v1804_v53 = vpop.permute.xlu0 %1803 }
 0x1ea   :  { %v1857_v26 = vsel %vm123_vm3, %v1853_v10, %v1760_v29 }
 0x1ed   :  { %v1772_v61 = vpop.permute.xlu1 %1771  ;;  %v1808_v60 = vpop.permute.xlu0 %1807 }
 0x1ee   :  { %v1859_v12 = vsel %vm128_vm4, %v1855_v15, %v1772_v61 }
 0x1ef   :  { %v1863_v59 = vsel %vm133_vm5, %v1859_v12, %v1788_v46 }
 0x1f0   :  { %v1867_v56 = vsel %vm138_vm6, %v1863_v59, %v1804_v53 }
 0x1f1   :  { %1872 = vst [vmem:[#allocation2 + $0x48] sm:$0xff] %v1867_v56  ;;  %v1776_v58 = vpop.permute.xlu1 %1775 }
 0x1f2   :  { %v1861_v38 = vsel %vm128_vm4, %v1857_v26, %v1776_v58 }
 0x1f3   :  { %v1865_v8 = vsel %vm133_vm5, %v1861_v38, %v1792_v35 }
 0x1f4   :  { %v1869_v52 = vsel %vm138_vm6, %v1865_v8, %v1808_v60 }
 0x1f5   :  { %1876 = vst [vmem:[#allocation2 + $0x68] sm:$0xff] %v1869_v52  ;;  %v1682_v25 = vpop.permute.xlu1 %1681 }
 0x1f6   :  { %v1838_v4 = vsel %vm133_vm5, %v1834_v34, %v1682_v25 }
 0x1f9   :  { %v1790_v5 = vpop.permute.xlu1 %1789 }
 0x1fa   :  { %v1864_v39 = vsel %vm133_vm5, %v1860_v14, %v1790_v5 }
 0x1fd   :  { %v1794_v47 = vpop.permute.xlu1 %1793 }
 0x1fe   :  { %v1866_v22 = vsel %vm133_vm5, %v1862_v42, %v1794_v47 }
 0x201   :  { %v1694_v16 = vpop.permute.xlu1 %1693 }
 0x202   :  { %v1840_v44 = vsel %vm138_vm6, %v1836_v21, %v1694_v16 }
 0x203   :  { %1873 = vst [vmem:[#allocation2 + $0x50] sm:$0xff] %v1840_v44 }
 0x205   :  { %v1698_v32 = vpop.permute.xlu1 %1697 }
 0x206   :  { %v1842_v33 = vsel %vm138_vm6, %v1838_v4, %v1698_v32 }
 0x207   :  { %1877 = vst [vmem:[#allocation2 + $0x70] sm:$0xff] %v1842_v33 }
 0x209   :  { %v1806_v3 = vpop.permute.xlu1 %1805 }
 0x20a   :  { %v1868_v27 = vsel %vm138_vm6, %v1864_v39, %v1806_v3 }
 0x20b   :  { %1874 = vst [vmem:[#allocation2 + $0x58] sm:$0xff] %v1868_v27 }
 0x20d   :  { %v1810_v24 = vpop.permute.xlu1 %1809 }
 0x20e   :  { %v1870_v50 = vsel %vm138_vm6, %v1866_v22, %v1810_v24 }
 0x20f   :  { %1878 = vst [vmem:[#allocation2 + $0x78] sm:$0xff] %v1870_v50 }
 0x210   :  { %1917 = shalt.err (!%p1914_p4)
}
 0x211   :  { %s1918_s7 = scalar_lea.hbm %s2896_s2, 2048 }
 0x212   :  { %p1919_p5 = scmp.ne.s32.totalorder %s2896_s2, %s1918_s7  ;;  %p1922_p6 = scmp.lt.u32.totalorder %s1918_s7, %s2896_s2 }
 0x214   :  { %p1924_p7 = pnand %p1922_p6, %p1919_p5 }
 0x216   :  { %1927 = shalt.err (!%p1924_p7)
}
 0x217   :  { %s1940_s12 = smov 256  }
 0x218   :  { %1890 = dma.vmem_to_hbm [thread:$0]  %s1885_s3, 2048, %s2896_s2, [#allocation3], %s1940_s12, %s1940_s12, %s1930_s13  }
 0x219   :  { %1928 = dma.done.wait [#allocation3], 2048  }
 0x21a   :  { %1929 = vsyncadd [#allocation3], 4294965248 }
 0x21b   :  { %1894 = vsyncpa [#allocation3], 1 }

</bundles_post_ra>
